<compile_context>
chip_gen: v5e
topology: v5e:2x2
jax: 0.10.0
libtpu: 0.0.40
codegen_flags: <defaults>
</compile_context>

<pallas_src>
import functools

import jax
import jax.numpy as jnp
from jax.experimental import pallas as pl
from jax.experimental.pallas import tpu as pltpu


def _dense_decoder_kernel(scale_ref, shift_ref, x_ref, o_ref):
    # scale_ref, shift_ref: (1,) f32 scalars in SMEM
    # x_ref, o_ref:         (block_m, N) tiles in VMEM
    s = scale_ref[0]
    b = shift_ref[0]
    o_ref[...] = (s * (x_ref[...].astype(jnp.float32) + b)).astype(o_ref.dtype)


def _target_tile_bytes():
    """Per-generation target size of one streamed tile (input or output)."""
    try:
        kind = jax.devices()[0].device_kind.lower()
    except Exception:
        return 4 << 20
    if "v5 lite" in kind or "v5e" in kind or "v5lite" in kind:
        return 2 << 20   # v5e: ~0.82 TB/s HBM, 16 MiB default scoped VMEM
    if "7" in kind:
        return 8 << 20   # v7x: ~3.2 TB/s HBM -> amortize ~0.35 us/step cost
    return 4 << 20       # v6e and everything else


def _choose_lanes(total):
    """Pick a lane width N that divides `total` exactly (no pad, no slice)."""
    # Prefer a multiple of 128 (unmasked vst), widest first.
    for k in range(8, 0, -1):          # 1024, 896, ..., 128
        n = 128 * k
        if total % n == 0:
            return n
    # Irregular total size: largest exact divisor <= 1024.  Stores may be
    # masked, but we still avoid any extra read+write pass over the tensor.
    best = 1
    for n in range(2, min(total, 1024) + 1):
        if total % n == 0:
            best = n
    return best


@jax.jit
def dense_decoder_forward(x, scale, shift):
    """Pallas implementation of DenseDecoder.forward: scale * (x + shift)."""
    T = x.size
    in_dtype = x.dtype
    out_dtype = jnp.result_type(in_dtype, scale.dtype, shift.dtype)

    N = _choose_lanes(T)
    M = T // N

    in_isz = jnp.dtype(in_dtype).itemsize
    out_isz = jnp.dtype(out_dtype).itemsize
    row_bytes = N * max(in_isz, out_isz)

    # Sublane packing: a non-full-extent row block must be a multiple of
    # 8 / 16 / 32 rows for 4 / 2 / 1-byte elements (use the tighter of in/out).
    pack = max(8, 32 // min(in_isz, out_isz))

    target = _target_tile_bytes()
    block_m = max(pack, (target // row_bytes) // pack * pack)
    if block_m >= M:
        block_m = M                      # single full-extent block (always legal)
    num_blocks = pl.cdiv(M, block_m)

    # v7x has 2 TensorCores per chip: give medium/large tensors >= 2 parallel
    # row blocks so both cores get work (no effect on single-TC v5e/v6e).
    total_bytes = T * max(in_isz, out_isz)
    if num_blocks == 1 and total_bytes > (2 << 20) and M >= 2 * pack:
        block_m = -(-((M + 1) // 2) // pack) * pack
        num_blocks = pl.cdiv(M, block_m)

    x2d = x.reshape(M, N)                # contiguous view -> no copy

    # in + out, double-buffered, plus headroom; stays inside v7x's 64 MiB VMEM.
    vmem_needed = 2 * block_m * N * (in_isz + out_isz) + (4 << 20)
    vmem_limit = int(min(56 << 20, max(32 << 20, vmem_needed)))

    out2d = pl.pallas_call(
        _dense_decoder_kernel,
        out_shape=jax.ShapeDtypeStruct((M, N), out_dtype),
        grid=(num_blocks,),
        in_specs=[
            # Scalar parameters: resident in SMEM, no tiling, no VMEM buffers.
            pl.BlockSpec(memory_space=pltpu.MemorySpace.SMEM),  # scale (1,)
            pl.BlockSpec(memory_space=pltpu.MemorySpace.SMEM),  # shift (1,)
            # Row-tiled input: double-buffered by the Pallas pipeline; the
            # last (possibly ragged) block is handled by the cdiv grid.
            pl.BlockSpec((block_m, N), lambda i: (i, 0)),
        ],
        out_specs=pl.BlockSpec((block_m, N), lambda i: (i, 0)),
        compiler_params=pltpu.CompilerParams(
            dimension_semantics=("parallel",),   # independent row tiles
            vmem_limit_bytes=vmem_limit,
        ),
    )(scale.astype(jnp.float32).reshape(1),
      shift.astype(jnp.float32).reshape(1),
      x2d)

    return out2d.reshape(x.shape)        # view again -> no copy


def init_dense_decoder_params(key, init_type="random", std=0.02, no_shift=False,
                              dtype=jnp.float32):
    """Deterministic re-implementation of DenseDecoder.reset_parameters."""
    if init_type == "random":
        scale = std * jax.random.normal(key, (1,), dtype=dtype)
    else:
        scale = jnp.ones((1,), dtype=dtype)
    # When no_shift=True PyTorch adds the scalar 0.0; a zero vector is equivalent.
    shift = jnp.zeros((1,), dtype=dtype)
    return scale, shift


if __name__ == "__main__":
    key = jax.random.PRNGKey(0)
    kx, kp = jax.random.split(key)

    # Small example input (B, C, H, W) as the forward implies (any shape works).
    x = jax.random.normal(kx, (2, 4, 16, 16), dtype=jnp.float32)
    scale, shift = init_dense_decoder_params(kp, init_type="random", std=0.02,
                                             no_shift=False, dtype=jnp.float32)

    out = jax.block_until_ready(dense_decoder_forward(x, scale, shift))
    ref = scale[0] * (x + shift[0])
    assert out.shape == x.shape and out.dtype == ref.dtype
    assert jnp.allclose(out, ref, atol=1e-6, rtol=1e-6), "mismatch vs reference"

    # bf16 input (exercises dtype-aware tiling + f32 output via type promotion).
    x2 = jax.random.normal(kx, (2, 4, 64, 64), dtype=jnp.bfloat16)
    out2 = jax.block_until_ready(dense_decoder_forward(x2, scale, shift))
    ref2 = scale[0] * (x2.astype(jnp.float32) + shift[0])
    assert out2.dtype == jnp.float32
    assert jnp.allclose(out2, ref2, atol=1e-2, rtol=1e-2)

    # Irregular total size (105 elements): pad-free fallback lane width.
    x3 = jax.random.normal(kx, (3, 5, 7), dtype=jnp.float32)
    out3 = jax.block_until_ready(dense_decoder_forward(x3, scale, shift))
    assert jnp.allclose(out3, scale[0] * (x3 + shift[0]), atol=1e-6, rtol=1e-6)

    print("KERNEL_OK")
</pallas_src>

<mosaic_0001>
module attributes {stable_mosaic.version = 11 : i64} {
  func.func @_dense_decoder_kernel(%arg0: i32, %arg1: memref<1xf32, #tpu.memory_space<smem>>, %arg2: memref<1xf32, #tpu.memory_space<smem>>, %arg3: memref<2x1024xf32, #tpu.memory_space<vmem>>, %arg4: memref<2x1024xf32, #tpu.memory_space<vmem>>) attributes {dimension_semantics = [#tpu.dimension_semantics<parallel>], iteration_bounds = array<i64: 1>, scalar_prefetch = 0 : i64, scratch_operands = 0 : i64, tpu.core_type = #tpu.core_type<tc>, window_params = [{transform_indices = @transform_0, window_bounds = array<i64: 1>}, {transform_indices = @transform_1, window_bounds = array<i64: 1>}, {transform_indices = @transform_2, window_bounds = array<i64: 2, 1024>}, {transform_indices = @transform_3, window_bounds = array<i64: 2, 1024>}]} {
    %c0 = arith.constant 0 : index
    %0 = memref.load %arg1[%c0] : memref<1xf32, #tpu.memory_space<smem>>
    %c0_0 = arith.constant 0 : index
    %1 = memref.load %arg2[%c0_0] : memref<1xf32, #tpu.memory_space<smem>>
    %c0_1 = arith.constant 0 : index
    %c0_2 = arith.constant 0 : index
    %2 = vector.load %arg3[%c0_1, %c0_2] : memref<2x1024xf32, #tpu.memory_space<vmem>>, vector<2x1024xf32>
    %3 = vector.broadcast %1 : f32 to vector<2x1024xf32>
    %4 = arith.addf %2, %3 : vector<2x1024xf32>
    %5 = vector.broadcast %0 : f32 to vector<2x1024xf32>
    %6 = arith.mulf %5, %4 : vector<2x1024xf32>
    %c0_3 = arith.constant 0 : index
    %c0_4 = arith.constant 0 : index
    %7 = vector.load %arg4[%c0_3, %c0_4] : memref<2x1024xf32, #tpu.memory_space<vmem>>, vector<2x1024xf32>
    tpu.vector_store %arg4[%c0_3, %c0_4], %6 {strides = array<i32>} : memref<2x1024xf32, #tpu.memory_space<vmem>>, vector<2x1024xf32>,
    return
  }
  func.func @transform_0(%arg0: i32) -> i32 {
    %c0_i32 = arith.constant 0 : i32
    %c0_i32_0 = arith.constant 0 : i32
    return %c0_i32 : i32
  }
  func.func @transform_1(%arg0: i32) -> i32 {
    %c0_i32 = arith.constant 0 : i32
    %c0_i32_0 = arith.constant 0 : i32
    return %c0_i32 : i32
  }
  func.func @transform_2(%arg0: i32) -> (i32, i32) {
    %c0_i32 = arith.constant 0 : i32
    %c0_i32_0 = arith.constant 0 : i32
    return %arg0, %c0_i32 : i32, i32
  }
  func.func @transform_3(%arg0: i32) -> (i32, i32) {
    %c0_i32 = arith.constant 0 : i32
    %c0_i32_0 = arith.constant 0 : i32
    return %arg0, %c0_i32 : i32, i32
  }
}

</mosaic_0001>

<bundles_post_ra>
// kernel: dense_decoder_forward.1
= control target key start
LH: loop header
LB: loop body
LE: loop exit
PB: predicated region body
PF: predicated region fallthrough
CT: control target
= control target key end

     0   :  { %s70_s0 = inlined_call_operand.<no memory space> [shape: f32[1], index: 0, kind: input, shape index: {}]   ;;  %s71_s1 = inlined_call_operand.<no memory space> [shape: f32[1], index: 1, kind: input, shape index: {}]   ;;  %s72_s2 = inlined_call_operand.vmem [shape: f32[2,1024], index: 2, kind: input, shape index: {}]   ;;  %s73_s3 = inlined_call_operand.vmem [shape: f32[2,1024], index: 3, kind: output, shape index: {}]  }
   0x1   :  { %v18_v0 = vld [vmem:[%s72_s2] sm:$0xff]  ;;  %v20_v1 = vstv %s71_s1  ;;  %v23_v2 = vstv %s70_s0  ;;  %v19_v3 = vld [vmem:[%s72_s2 + $0x8] sm:$0xff] }
   0x2   :  { %v21_v4 = vadd.f32 %v20_v1, %v18_v0  ;;  %v22_v5 = vadd.f32 %v20_v1, %v19_v3 }
   0x4   :  { %v24_v6 = vmul.f32 %v23_v2, %v21_v4  ;;  %v25_v7 = vmul.f32 %v23_v2, %v22_v5 }
   0x6   :  { %26 = vst [vmem:[%s73_s3] sm:$0xff] %v24_v6 }
   0x7   :  { %27 = vst [vmem:[%s73_s3 + $0x8] sm:$0xff] %v25_v7 }

</bundles_post_ra>
